<compile_context>
chip_gen: v5e
topology: v5e:2x2
jax: 0.10.0
libtpu: 0.0.40
codegen_flags: <defaults>
</compile_context>

<pallas_src>
import functools
import math

import jax
import jax.numpy as jnp
import numpy as np
from jax.experimental import pallas as pl
from jax.experimental.pallas import tpu as pltpu


# ------------------------------ model config ------------------------------- #

BACKBONE_CH = [8, 8, 16, 32, 64, 128]   # [padded input C, conv0..conv4 Cout]
HEAD_CIN = [128, 64, 32]                # FPN feature channels per level (s 32/16/8)
RAW_CIN = 3                             # true input channels


def _round_up(v, m):
    return ((v + m - 1) // m) * m


def _conv_mode(cin):
    # 9-tap im2col only pays off when its padded K is strictly smaller than the
    # 16-tap space-to-depth K; otherwise keep s2d (4 contiguous slices).
    return "im2col9" if _round_up(9 * cin, 128) < 16 * cin else "s2d"


CONV_MODES = [_conv_mode(BACKBONE_CH[i]) for i in range(5)]   # s2d,s2d,s2d,9tap,9tap


# ----------------------------- Pallas kernels ------------------------------- #

def _matmul_bias_act_1k_kernel(x_ref, w_ref, b_ref, o_ref, *, leaky):
    """Single-K-step fast path: no accumulator scratch round trip."""
    y = jnp.dot(x_ref[...], w_ref[...], preferred_element_type=jnp.float32)
    y = y + b_ref[...]
    if leaky:
        y = jnp.where(y > 0, y, 0.1 * y)          # LeakyReLU(0.1)
    o_ref[...] = y.astype(o_ref.dtype)


def _matmul_bias_act_kernel(x_ref, w_ref, b_ref, o_ref, acc_ref, *, leaky):
    """Multi-K-step path: f32 VMEM accumulator, no zero-init store."""
    k = pl.program_id(2)
    p = jnp.dot(x_ref[...], w_ref[...], preferred_element_type=jnp.float32)

    @pl.when(k == 0)
    def _first():
        acc_ref[...] = p

    @pl.when(k > 0)
    def _rest():
        acc_ref[...] += p

    @pl.when(k == pl.num_programs(2) - 1)
    def _epilogue():
        y = acc_ref[...] + b_ref[...]
        if leaky:
            y = jnp.where(y > 0, y, 0.1 * y)
        o_ref[...] = y.astype(o_ref.dtype)


def pallas_matmul_bias_act(x2d, w2d, b2d, *, leaky, out_dtype=jnp.float32):
    """y = act(x2d @ w2d + b2d) on the MXU.

    x2d: (M, K) (cast to bf16), w2d: (K, Np) bf16 with Np % 128 == 0 (padded at
    init), b2d: (1, Np) f32.  Tiled over (M, N, K); returns (M, Np) out_dtype.
    """
    M, K = x2d.shape
    K2, Np = w2d.shape
    assert K == K2 and Np % 128 == 0

    x2d = x2d.astype(jnp.bfloat16)
    w2d = w2d.astype(jnp.bfloat16)
    b2d = b2d.astype(jnp.float32)

    # --- M tiling: as few grid steps as possible, but >= 2 M blocks for large
    # M so both TensorCores are used on megacore parts (v7x). ---
    if M <= 256:
        Mp = _round_up(M, 16)
        tm = Mp
    else:
        nb = max(2, pl.cdiv(M, 1024))
        tm = _round_up(pl.cdiv(M, nb), 16)
        Mp = tm * nb
    if Mp != M:
        x2d = jnp.pad(x2d, ((0, Mp - M), (0, 0)))

    # --- K tiling: single full-K block for every layer of this model; cap the
    # per-step granule at 256 only for genuinely large aligned K (v5e). ---
    if K <= 640:
        tk = K
    elif K % 256 == 0:
        tk = 256
    elif K % 128 == 0:
        tk = 128
    else:
        tk = K

    tn = 128                       # Np is always 128 here; lane-dense output

    nk = pl.cdiv(K, tk)
    grid = (Mp // tm, Np // tn, nk)

    if nk == 1:
        kernel = functools.partial(_matmul_bias_act_1k_kernel, leaky=leaky)
        scratch = []
    else:
        kernel = functools.partial(_matmul_bias_act_kernel, leaky=leaky)
        scratch = [pltpu.VMEM((tm, tn), jnp.float32)]

    cost = pl.CostEstimate(
        flops=2 * Mp * K * Np,
        transcendentals=0,
        bytes_accessed=Mp * K * 2 + K * Np * 2 + Np * 4
        + Mp * Np * jnp.dtype(out_dtype).itemsize,
    )

    out = pl.pallas_call(
        kernel,
        out_shape=jax.ShapeDtypeStruct((Mp, Np), out_dtype),
        grid_spec=pltpu.PrefetchScalarGridSpec(
            num_scalar_prefetch=0,
            grid=grid,
            in_specs=[
                pl.BlockSpec((tm, tk), lambda i, j, k: (i, k)),
                pl.BlockSpec((tk, tn), lambda i, j, k: (k, j)),
                pl.BlockSpec((1, tn), lambda i, j, k: (0, j)),
            ],
            out_specs=pl.BlockSpec((tm, tn), lambda i, j, k: (i, j)),
            scratch_shapes=scratch,
        ),
        compiler_params=pltpu.CompilerParams(
            dimension_semantics=("parallel", "parallel", "arbitrary"),
            vmem_limit_bytes=32 * 1024 * 1024,
            # let XLA fuse the im2col slice/concat/pad chain into the x DMA
            allow_input_fusion=[True, False, False],
        ),
        cost_estimate=cost,
    )(x2d, w2d, b2d)
    return out if Mp == M else out[:M]


# ------------------- conv via patch-extraction + matmul --------------------- #

def conv3x3_s2_s2d(x, w2d, b2d, cout, leaky=True):
    """3x3/s2/p1 conv as a 2x2/s1 conv on the factor-2 space-to-depth input
    (4 contiguous tap slices, K = 16*cin, already 128-aligned)."""
    n, hh, ww, c = x.shape
    oh, ow = hh // 2, ww // 2
    xs = x.reshape(n, oh, 2, ow, 2, c)
    xs = jnp.transpose(xs, (0, 1, 3, 2, 4, 5)).reshape(n, oh, ow, 4 * c)
    xsp = jnp.pad(xs, ((0, 0), (1, 0), (1, 0), (0, 0)))        # only top/left read
    taps = [xsp[:, a:a + oh, b:b + ow, :] for a in (0, 1) for b in (0, 1)]
    patches = jnp.concatenate(taps, axis=-1).reshape(n * oh * ow, 16 * c)
    y = pallas_matmul_bias_act(patches, w2d, b2d, leaky=leaky, out_dtype=jnp.bfloat16)
    return y[:, :cout].reshape(n, oh, ow, cout)


def conv3x3_s2_9tap(x, w2d, b2d, cout, leaky=True):
    """3x3/s2/p1 conv as a direct 9-tap im2col (K = 9*cin padded to 128 mult)."""
    n, hh, ww, c = x.shape
    oh, ow = hh // 2, ww // 2
    kp = w2d.shape[0]
    xp = jnp.pad(x, ((0, 0), (1, 1), (1, 1), (0, 0)))
    taps = [xp[:, di:di + hh:2, dj:dj + ww:2, :]
            for di in range(3) for dj in range(3)]
    patches = jnp.concatenate(taps, axis=-1).reshape(n * oh * ow, 9 * c)
    if 9 * c < kp:
        patches = jnp.pad(patches, ((0, 0), (0, kp - 9 * c)))
    y = pallas_matmul_bias_act(patches, w2d, b2d, leaky=leaky, out_dtype=jnp.bfloat16)
    return y[:, :cout].reshape(n, oh, ow, cout)


# ---------------------- fused three-level head kernel ----------------------- #

def _fused_head_kernel(lvl_ref, x_ref, w_ref, b_ref, o_ref):
    del lvl_ref                       # only used by the index_maps
    y = jnp.dot(x_ref[...], w_ref[0], preferred_element_type=jnp.float32)
    y = y + b_ref[0]
    o_ref[...] = y.astype(o_ref.dtype)


def fused_heads(feats, w_stk, b_stk, ncls):
    """All three FPN-level cls/reg/obj heads in a single pallas_call.

    feats: list of 3 NHWC bf16 feature maps (strides 32/16/8).
    w_stk: (3, 128, 128) bf16, b_stk: (3, 1, 128) f32 (fused + padded at init).
    """
    n = feats[0].shape[0]
    kp, npad = w_stk.shape[1], w_stk.shape[2]
    shapes = [(f.shape[1], f.shape[2], f.shape[3]) for f in feats]
    m_list = [n * s[0] * s[1] for s in shapes]
    tm = min(128, _round_up(max(m_list), 16))
    mp_list = [_round_up(m, tm) for m in m_list]
    nblk = [mp // tm for mp in mp_list]

    x_parts = []
    for f, m, mp in zip(feats, m_list, mp_list):
        x2d = f.reshape(m, f.shape[3]).astype(jnp.bfloat16)
        x2d = jnp.pad(x2d, ((0, mp - m), (0, kp - f.shape[3])))
        x_parts.append(x2d)
    x_cat = jnp.concatenate(x_parts, axis=0)                   # (Mtot, 128)

    lvl_ids = jnp.asarray(np.concatenate(
        [np.full(nb, l, np.int32) for l, nb in enumerate(nblk)]))
    total_blocks = int(lvl_ids.shape[0])

    out = pl.pallas_call(
        _fused_head_kernel,
        out_shape=jax.ShapeDtypeStruct((x_cat.shape[0], npad), jnp.bfloat16),
        grid_spec=pltpu.PrefetchScalarGridSpec(
            num_scalar_prefetch=1,
            grid=(total_blocks,),
            in_specs=[
                pl.BlockSpec((tm, kp), lambda i, lvl: (i, 0)),
                pl.BlockSpec((1, kp, npad), lambda i, lvl: (lvl[i], 0, 0)),
                pl.BlockSpec((1, 1, npad), lambda i, lvl: (lvl[i], 0, 0)),
            ],
            out_specs=pl.BlockSpec((tm, npad), lambda i, lvl: (i, 0)),
        ),
        compiler_params=pltpu.CompilerParams(
            dimension_semantics=("parallel",),
            vmem_limit_bytes=32 * 1024 * 1024,
        ),
    )(lvl_ids, x_cat, w_stk, b_stk)

    cls_out, reg_out, obj_out = [], [], []
    off = 0
    for (hh, ww, _), m, mp in zip(shapes, m_list, mp_list):
        y = out[off:off + m, :ncls + 5].astype(jnp.float32)
        y = y.reshape(n, hh, ww, ncls + 5)
        off += mp
        cls_out.append(jnp.transpose(y[..., :ncls], (0, 3, 1, 2)))
        reg_out.append(jnp.transpose(y[..., ncls:ncls + 4], (0, 3, 1, 2)))
        obj_out.append(jnp.transpose(y[..., ncls + 4:ncls + 5], (0, 3, 1, 2)))
    return cls_out, reg_out, obj_out


# -------------------- parameters (built & padded once) --------------------- #

def _make_conv3x3_params_s2d(w_raw, b_raw):
    """(3,3,cin,cout) -> ((16*cin, Np) bf16, (1, Np) f32), s2d/2x2 remapping."""
    _, _, cin, cout = w_raw.shape
    np_ = _round_up(cout, 128)
    tap = {0: (0, 1), 1: (1, 0), 2: (1, 1)}     # kernel offset -> (cell, phase)
    w16 = jnp.zeros((2, 2, 2, 2, cin, cout), jnp.float32)
    for di in range(3):
        a, pr = tap[di]
        for dj in range(3):
            b, pc = tap[dj]
            w16 = w16.at[a, b, pr, pc].set(w_raw[di, dj])
    w2d = w16.reshape(16 * cin, cout)
    w2d = jnp.pad(w2d, ((0, 0), (0, np_ - cout))).astype(jnp.bfloat16)
    b2d = jnp.pad(b_raw.reshape(1, cout), ((0, 0), (0, np_ - cout))).astype(jnp.float32)
    return w2d, b2d


def _make_conv3x3_params_9tap(w_raw, b_raw):
    """(3,3,cin,cout) -> ((Kp, Np) bf16, (1, Np) f32), direct 9-tap im2col."""
    _, _, cin, cout = w_raw.shape
    kp = _round_up(9 * cin, 128)
    np_ = _round_up(cout, 128)
    w2d = w_raw.reshape(9 * cin, cout)
    w2d = jnp.pad(w2d, ((0, kp - 9 * cin), (0, np_ - cout))).astype(jnp.bfloat16)
    b2d = jnp.pad(b_raw.reshape(1, cout), ((0, 0), (0, np_ - cout))).astype(jnp.float32)
    return w2d, b2d


def _make_fused_head_params(level_params):
    """Fuse cls/reg/obj along Cout per level, pad K/N to 128, stack levels."""
    kp = _round_up(max(p[0] for p in level_params), 128)
    np_ = _round_up(level_params[0][1].shape[1] + 4 + 1, 128)
    ws, bs = [], []
    for cin, w_cls, b_cls, w_reg, b_reg, w_obj, b_obj in level_params:
        w = jnp.concatenate([w_cls, w_reg, w_obj], axis=1)     # (cin, ncls+5)
        b = jnp.concatenate([b_cls, b_reg, b_obj], axis=0)
        co = w.shape[1]
        ws.append(jnp.pad(w, ((0, kp - cin), (0, np_ - co))).astype(jnp.bfloat16))
        bs.append(jnp.pad(b.reshape(1, co), ((0, 0), (0, np_ - co))).astype(jnp.float32))
    return jnp.stack(ws), jnp.stack(bs)


def init_params(num_cats):
    key = jax.random.PRNGKey(0)
    keys = jax.random.split(key, 16)
    params = {}
    for i in range(5):
        cin_pad, cout = BACKBONE_CH[i], BACKBONE_CH[i + 1]
        cin = RAW_CIN if i == 0 else cin_pad
        kw_, kb_ = jax.random.split(keys[i])
        w = jax.random.normal(kw_, (3, 3, cin, cout), jnp.float32) / math.sqrt(9 * cin)
        b = 0.01 * jax.random.normal(kb_, (cout,), jnp.float32)
        if cin < cin_pad:   # conv0: pad raw 3 input channels to 8 (zero weights)
            w = jnp.pad(w, ((0, 0), (0, 0), (0, cin_pad - cin), (0, 0)))
        if CONV_MODES[i] == "s2d":
            w2d, b2d = _make_conv3x3_params_s2d(w, b)
        else:
            w2d, b2d = _make_conv3x3_params_9tap(w, b)
        params[f"conv{i}_w"] = w2d
        params[f"conv{i}_b"] = b2d

    ncls = num_cats + 1
    level_params = []
    for lvl in range(3):
        cin = HEAD_CIN[lvl]
        ks = jax.random.split(keys[8 + lvl], 6)
        w_cls = jax.random.normal(ks[0], (cin, ncls), jnp.float32) / math.sqrt(cin)
        b_cls = 0.01 * jax.random.normal(ks[1], (ncls,), jnp.float32)
        w_reg = jax.random.normal(ks[2], (cin, 4), jnp.float32) / math.sqrt(cin)
        b_reg = 0.01 * jax.random.normal(ks[3], (4,), jnp.float32)
        w_obj = jax.random.normal(ks[4], (cin, 1), jnp.float32) / math.sqrt(cin)
        b_obj = 0.01 * jax.random.normal(ks[5], (1,), jnp.float32)
        level_params.append((cin, w_cls, b_cls, w_reg, b_reg, w_obj, b_obj))
    params["head_w"], params["head_b"] = _make_fused_head_params(level_params)
    return params


# ------------------------------ forward pass -------------------------------- #

def yolox_forward(x_nchw, params, *, num_cats):
    """Returns ([cls32, cls16, cls8], [reg32, reg16, reg8], [obj32, obj16, obj8]),
    each NCHW float32 (same structure as YOLOX.forward)."""
    ncls = num_cats + 1
    x = jnp.transpose(x_nchw.astype(jnp.float32), (0, 2, 3, 1))      # NCHW -> NHWC
    # pad input channels once (3 -> 8) so conv0's K = 16*Cin is 128-aligned
    x = jnp.pad(x, ((0, 0), (0, 0), (0, 0), (0, BACKBONE_CH[0] - x.shape[-1])))
    h = x.astype(jnp.bfloat16)

    feats = []
    for i in range(5):
        conv = conv3x3_s2_s2d if CONV_MODES[i] == "s2d" else conv3x3_s2_9tap
        h = conv(h, params[f"conv{i}_w"], params[f"conv{i}_b"],
                 cout=BACKBONE_CH[i + 1], leaky=True)
        feats.append(h)
    # FPN features follow self.strides = [32, 16, 8]
    fpn = [feats[4], feats[3], feats[2]]

    return fused_heads(fpn, params["head_w"], params["head_b"], ncls)


# ---------------------------------- main ------------------------------------ #

if __name__ == "__main__":
    NUM_CATS = 4
    IMG_DIM = 64      # strides [32, 16, 8] -> FPN spatial sizes [2, 4, 8]
    BATCH = 2

    ka, kb, kc, kd, ke, kf, kg = jax.random.split(jax.random.PRNGKey(0), 7)

    # --- check 1: multi-K-step matmul+bias+LeakyReLU kernel vs XLA reference ---
    xt = jax.random.normal(ka, (200, 768), jnp.float32)
    wt = jax.random.normal(kb, (768, 128), jnp.float32) * 0.05
    bt = jax.random.normal(kc, (1, 128), jnp.float32) * 0.1
    yk = pallas_matmul_bias_act(xt, wt, bt, leaky=True, out_dtype=jnp.float32)
    xr = xt.astype(jnp.bfloat16).astype(jnp.float32)
    wr = wt.astype(jnp.bfloat16).astype(jnp.float32)
    yr = jnp.dot(xr, wr) + bt
    yr = jnp.where(yr > 0, yr, 0.1 * yr)
    err = float(jnp.max(jnp.abs(yk - yr)))
    tol = 2e-2 * float(jnp.max(jnp.abs(yr))) + 1e-3
    assert err < tol, f"matmul kernel mismatch: {err} > {tol}"

    # --- check 2: space-to-depth conv reformulation vs lax.conv reference ---
    xc = jax.random.normal(kd, (2, 16, 16, 8), jnp.float32)
    wc = jax.random.normal(ke, (3, 3, 8, 16), jnp.float32) / math.sqrt(72.0)
    bc = 0.01 * jnp.arange(16, dtype=jnp.float32)
    w2d_t, b2d_t = _make_conv3x3_params_s2d(wc, bc)
    yck = conv3x3_s2_s2d(xc, w2d_t, b2d_t, cout=16, leaky=True).astype(jnp.float32)
    ycr = jax.lax.conv_general_dilated(
        xc, wc, window_strides=(2, 2), padding=((1, 1), (1, 1)),
        dimension_numbers=("NHWC", "HWIO", "NHWC")) + bc
    ycr = jnp.where(ycr > 0, ycr, 0.1 * ycr)
    cerr = float(jnp.max(jnp.abs(yck - ycr)))
    ctol = 5e-2 * float(jnp.max(jnp.abs(ycr))) + 1e-2
    assert cerr < ctol, f"s2d conv reformulation mismatch: {cerr} > {ctol}"

    # --- check 3: 9-tap im2col conv path vs lax.conv reference ---
    xc2 = jax.random.normal(kf, (2, 8, 8, 32), jnp.float32)
    wc2 = jax.random.normal(kg, (3, 3, 32, 24), jnp.float32) / math.sqrt(9 * 32.0)
    bc2 = 0.01 * jnp.arange(24, dtype=jnp.float32)
    w2d_t2, b2d_t2 = _make_conv3x3_params_9tap(wc2, bc2)
    yck2 = conv3x3_s2_9tap(xc2, w2d_t2, b2d_t2, cout=24, leaky=True).astype(jnp.float32)
    ycr2 = jax.lax.conv_general_dilated(
        xc2, wc2, window_strides=(2, 2), padding=((1, 1), (1, 1)),
        dimension_numbers=("NHWC", "HWIO", "NHWC")) + bc2
    ycr2 = jnp.where(ycr2 > 0, ycr2, 0.1 * ycr2)
    cerr2 = float(jnp.max(jnp.abs(yck2 - ycr2)))
    ctol2 = 5e-2 * float(jnp.max(jnp.abs(ycr2))) + 2e-2
    assert cerr2 < ctol2, f"9-tap conv reformulation mismatch: {cerr2} > {ctol2}"

    # --- full forward ---
    params = init_params(NUM_CATS)
    x = jax.random.normal(jax.random.PRNGKey(0),
                          (BATCH, 3, IMG_DIM, IMG_DIM), jnp.float32)
    fwd = jax.jit(functools.partial(yolox_forward, num_cats=NUM_CATS))
    cls_out, reg_out, obj_out = fwd(x, params)
    for t in cls_out + reg_out + obj_out:
        jax.block_until_ready(t)

    expected_hw = [IMG_DIM // 32, IMG_DIM // 16, IMG_DIM // 8]
    for lvl in range(3):
        hw = expected_hw[lvl]
        assert cls_out[lvl].shape == (BATCH, NUM_CATS + 1, hw, hw)
        assert reg_out[lvl].shape == (BATCH, 4, hw, hw)
        assert obj_out[lvl].shape == (BATCH, 1, hw, hw)

    print("KERNEL_OK")
</pallas_src>

<mosaic_0001>
module attributes {stable_mosaic.version = 11 : i64} {
  func.func @_matmul_bias_act_kernel(%arg0: i32, %arg1: i32, %arg2: i32, %arg3: memref<208x256xbf16, #tpu.memory_space<vmem>>, %arg4: memref<256x128xbf16, #tpu.memory_space<vmem>>, %arg5: memref<1x128xf32, #tpu.memory_space<vmem>>, %arg6: memref<208x128xf32, #tpu.memory_space<vmem>>, %arg7: memref<208x128xf32, #tpu.memory_space<vmem>>) attributes {dimension_semantics = [#tpu.dimension_semantics<parallel>, #tpu.dimension_semantics<parallel>, #tpu.dimension_semantics<arbitrary>], iteration_bounds = array<i64: 1, 1, 3>, scalar_prefetch = 0 : i64, scratch_operands = 1 : i64, tpu.core_type = #tpu.core_type<tc>, window_params = [{transform_indices = @transform_0, window_bounds = array<i64: 208, 256>}, {transform_indices = @transform_1, window_bounds = array<i64: 256, 128>}, {transform_indices = @transform_2, window_bounds = array<i64: 1, 128>}, {transform_indices = @transform_3, window_bounds = array<i64: 208, 128>}]} {
    %c0 = arith.constant 0 : index
    %c0_0 = arith.constant 0 : index
    %0 = vector.load %arg3[%c0, %c0_0] : memref<208x256xbf16, #tpu.memory_space<vmem>>, vector<208x256xbf16>
    %c0_1 = arith.constant 0 : index
    %c0_2 = arith.constant 0 : index
    %1 = vector.load %arg4[%c0_1, %c0_2] : memref<256x128xbf16, #tpu.memory_space<vmem>>, vector<256x128xbf16>
    %cst = arith.constant dense<0.000000e+00> : vector<208x128xf32>
    %2 = tpu.matmul %0, %1, %cst {dimension_numbers = #tpu.dot_dimension_numbers<[1], [0], [0], [1], [0, 0, 1, 1], [], []>} : vector<208x256xbf16>, vector<256x128xbf16>, vector<208x128xf32> -> vector<208x128xf32>
    %c0_i32 = arith.constant 0 : i32
    %3 = arith.cmpi eq, %arg2, %c0_i32 : i32
    %4 = arith.extui %3 : i1 to i32
    %c0_i32_3 = arith.constant 0 : i32
    %5 = arith.cmpi ne, %4, %c0_i32_3 : i32
    scf.if %5 {
      %c0_7 = arith.constant 0 : index
      %c0_8 = arith.constant 0 : index
      %12 = vector.load %arg7[%c0_7, %c0_8] : memref<208x128xf32, #tpu.memory_space<vmem>>, vector<208x128xf32>
      tpu.vector_store %arg7[%c0_7, %c0_8], %2 {strides = array<i32>} : memref<208x128xf32, #tpu.memory_space<vmem>>, vector<208x128xf32>,
    } else {
    }
    %c0_i32_4 = arith.constant 0 : i32
    %6 = arith.cmpi sgt, %arg2, %c0_i32_4 : i32
    %7 = arith.extui %6 : i1 to i32
    %c0_i32_5 = arith.constant 0 : i32
    %8 = arith.cmpi ne, %7, %c0_i32_5 : i32
    scf.if %8 {
      %c0_7 = arith.constant 0 : index
      %c0_8 = arith.constant 0 : index
      %12 = vector.load %arg7[%c0_7, %c0_8] : memref<208x128xf32, #tpu.memory_space<vmem>>, vector<208x128xf32>
      %13 = arith.addf %12, %2 : vector<208x128xf32>
      %c0_9 = arith.constant 0 : index
      %c0_10 = arith.constant 0 : index
      %14 = vector.load %arg7[%c0_9, %c0_10] : memref<208x128xf32, #tpu.memory_space<vmem>>, vector<208x128xf32>
      tpu.vector_store %arg7[%c0_9, %c0_10], %13 {strides = array<i32>} : memref<208x128xf32, #tpu.memory_space<vmem>>, vector<208x128xf32>,
    } else {
    }
    %c2_i32 = arith.constant 2 : i32
    %9 = arith.cmpi eq, %arg2, %c2_i32 : i32
    %10 = arith.extui %9 : i1 to i32
    %c0_i32_6 = arith.constant 0 : i32
    %11 = arith.cmpi ne, %10, %c0_i32_6 : i32
    scf.if %11 {
      %c0_7 = arith.constant 0 : index
      %c0_8 = arith.constant 0 : index
      %12 = vector.load %arg7[%c0_7, %c0_8] : memref<208x128xf32, #tpu.memory_space<vmem>>, vector<208x128xf32>
      %c0_9 = arith.constant 0 : index
      %c0_10 = arith.constant 0 : index
      %13 = vector.load %arg5[%c0_9, %c0_10] : memref<1x128xf32, #tpu.memory_space<vmem>>, vector<1x128xf32>
      %14 = vector.broadcast %13 : vector<1x128xf32> to vector<208x128xf32>
      %15 = arith.addf %12, %14 : vector<208x128xf32>
      %cst_11 = arith.constant 0.000000e+00 : f32
      %16 = vector.broadcast %cst_11 : f32 to vector<208x128xf32>
      %17 = arith.cmpf ogt, %15, %16 : vector<208x128xf32>
      %cst_12 = arith.constant 1.000000e-01 : f32
      %18 = vector.broadcast %cst_12 : f32 to vector<208x128xf32>
      %19 = arith.mulf %18, %15 : vector<208x128xf32>
      %20 = arith.select %17, %15, %19 : vector<208x128xi1>, vector<208x128xf32>
      %c0_13 = arith.constant 0 : index
      %c0_14 = arith.constant 0 : index
      %21 = vector.load %arg6[%c0_13, %c0_14] : memref<208x128xf32, #tpu.memory_space<vmem>>, vector<208x128xf32>
      tpu.vector_store %arg6[%c0_13, %c0_14], %20 {strides = array<i32>} : memref<208x128xf32, #tpu.memory_space<vmem>>, vector<208x128xf32>,
    } else {
    }
    return
  }
  func.func @transform_0(%arg0: i32, %arg1: i32, %arg2: i32) -> (i32, i32) {
    %c0_i32 = arith.constant 0 : i32
    return %arg0, %arg2 : i32, i32
  }
  func.func @transform_1(%arg0: i32, %arg1: i32, %arg2: i32) -> (i32, i32) {
    %c0_i32 = arith.constant 0 : i32
    return %arg2, %arg1 : i32, i32
  }
  func.func @transform_2(%arg0: i32, %arg1: i32, %arg2: i32) -> (i32, i32) {
    %c0_i32 = arith.constant 0 : i32
    %c0_i32_0 = arith.constant 0 : i32
    return %c0_i32, %arg1 : i32, i32
  }
  func.func @transform_3(%arg0: i32, %arg1: i32, %arg2: i32) -> (i32, i32) {
    %c0_i32 = arith.constant 0 : i32
    return %arg0, %arg1 : i32, i32
  }
}

</mosaic_0001>

<bundles_post_ra>
// kernel: tpu_custom_call.1
= control target key start
LH: loop header
LB: loop body
LE: loop exit
PB: predicated region body
PF: predicated region fallthrough
CT: control target
= control target key end

     0   :  { %8 = vsyncpa [#allocation4], 0  ;;  %s1923_s0 = inlined_call_operand.hbm [shape: bf16[208,768], index: 0, kind: input, shape index: {}]   ;;  %s1924_s1 = inlined_call_operand.hbm [shape: bf16[768,128], index: 1, kind: input, shape index: {}]   ;;  %s1925_s2 = inlined_call_operand.vmem [shape: f32[1,128], index: 2, kind: input, shape index: {}]   ;;  %s1926_s3 = inlined_call_operand.hbm [shape: f32[208,128], index: 3, kind: output, shape index: {}]  }
   0x1   :  { %10 = vsyncpa [#allocation4 + $0x1], 0 }
   0x2   :  { %11 = vsyncpa [#allocation7], 0 }
   0x3   :  { %13 = vsyncpa [#allocation7 + $0x1], 0 }
   0x4   :  { %14 = vsyncpa [#allocation5], 0  ;;  %s1601_s12 = smov 0   ;;  %s1603_s13 = smov 0  }
   0x5   :  { %s1605_s14 = smov 0   ;;  %s1607_s15 = smov 0  }
   0x6   :  { %s1609_s16 = smov 0   ;;  %s1611_s17 = smov 0  }
   0x7 LB: > { %s1927_s18 = sadd.s32 4294967295, %s1571_s17   ;;  %s32_s19 = sadd.s32 1, %s1567_s16  ;;  %s1571_s17 = sphi %s1611_s17, %s20_s17   ;;  %s1567_s16 = sphi %s1609_s16, %s1935_s16   ;;  %s1563_s15 = sphi %s1607_s15, %s1934_s15   ;;  %s1559_s14 = sphi %s1605_s14, %s1933_s14   ;;  %s1555_s13 = sphi %s1603_s13, %s1932_s13   ;;  %s1551_s12 = sphi %s1601_s12, %s1931_s12  }
   0x8   : > { %p33_p0 = scmp.ge.s32.totalorder %s32_s19, 3  ;;  %s48_s20 = sadd.s32 1, %s1559_s14 }
   0x9   : > { %p55_p1 = scmp.ne.s32.totalorder %s1559_s14, %s1555_s13  ;;  %p56_p2 = scmp.eq.s32.totalorder %s1571_s17, 0 }
   0xa   : > { %s1937_s19 = smov (%p33_p0, %s32_s19), 0  ;;  %p61_p4 = scmp.ne.s32.totalorder %s1555_s13, %s1551_s12 }
   0xb   : > { %p57_p3 = por %p56_p2, %p55_p1  ;;  %s44_s21 = ssub.s32 %s1567_s16, %s1937_s19 }
   0xc   : > { %p62_p5 = scmp.eq.s32.totalorder %s1927_s18, 0  ;;  %p46_p6 = scmp.eq.s32.totalorder %s44_s21, 0 }
   0xd   : > { %p1365_p8 = scmp.lt.s32.totalorder %s1571_s17, 3  ;;  %s1651_s24 = sand.u32 1, %s1559_s14  }
   0xe   : > { %p1642_p7 = por %p62_p5, %p61_p4  ;;  %s1288_s25 = sshll.u32 %s1567_s16, 3 }
   0xf   : > { %s1648_s23 = scalar_select %p46_p6, %s1559_s14, %s48_s20  }
  0x10   : > { %s1348_s26 = smul.u32 208, %s1651_s24  ;;  %s185_s29 = scalar_lea.hbm %s1923_s0, %s1288_s25 }
  0x11   : > { %p1658_p9 = pnand %p1365_p8, %p57_p3  ;;  %s186_s4 = sshll.u32 %s185_s29, 4  ;;  %s187_s4 = int_to_ptr.hbm [resolvable:$true] %s186_s4 }
  0x12   : > { %s177_s5 = scalar_lea.vmem [#allocation3], %s1348_s26  ;;  %p1111_p10 = scmp.ge.s32.totalorder %s1571_s17, 1 }
  0x13   : > { %s188_s6 = sshll.u32 %s177_s5, 4  ;;  %s174_s7 = scalar_lea.sflag [#allocation4], %s1651_s24  ;;  %s189_s6 = int_to_ptr.vmem [resolvable:$true] %s188_s6 }
  0x14   : > { %s1573_s8 = smov 384   ;;  %s1574_s9 = smov 128  }
  0x15   : > { %s1575_s10 = smov 8   ;;  %p219_p11 = scmp.lt.s32.totalorder %s1571_s17, 4 }
  0x16   : > { %1361 = dma.hbm_to_vmem [thread:$0]  (!%p1658_p9), %s187_s4, 3328, %s189_s6, %s174_s7, %s1573_s8, %s1574_s9, %s1575_s10  }
  0x17   : > { %s1108_s11 = sshll.u32 %s1651_s24, 7  ;;  %s1289_s12 = sshll.u32 %s1567_s16, 7 }
  0x18   : > { %p220_p12 = pnand %p1111_p10, %p219_p11  ;;  %s208_s25 = scalar_lea.hbm %s1924_s1, %s1289_s12 }
  0x19   : > { %s202_s26 = scalar_lea.vmem [#allocation6], %s1108_s11  ;;  %s209_s28 = sshll.u32 %s208_s25, 4  ;;  %s210_s28 = int_to_ptr.hbm [resolvable:$true] %s209_s28 }
  0x1a   : > { %s211_s27 = sshll.u32 %s202_s26, 4  ;;  %s199_s29 = scalar_lea.sflag [#allocation7], %s1651_s24  ;;  %s212_s27 = int_to_ptr.vmem [resolvable:$true] %s211_s27 }
  0x1b   : > { %s1576_s5 = smov 64   ;;  %s1577_s18 = smov 4  }
  0x1c   : > { %1364 = dma.hbm_to_vmem [thread:$0]  (!%p1658_p9), %s210_s28, 2048, %s212_s27, %s199_s29, %s1576_s5, %s1576_s5, %s1577_s18  }
  0x1d   : > { %223 = sbr.rel (%p220_p12) target bundleno = 415 (0x19f), region = 32  ;;  %s225_s4 = sand.u32 (!%p220_p12), 1, %s1555_s13  }
  0x1e   : > { %s1349_s6 = smul.u32 (!%p220_p12), 208, %s225_s4  ;;  %s226_s7 = scalar_lea.sflag (!%p220_p12), [#allocation4], %s225_s4 }
  0x20   : > { %s1676_s8 = scalar_lea.vmem (!%p220_p12), [#allocation3], %s1349_s6 }
  0x22   : > { %1538 = dma.done.wait (%p1642_p7), %s226_s7, 3328  }
  0x23   : > { %1540 = vsyncadd (%p1642_p7), %s226_s7, 4294963968  ;;  %s1112_s9 = sshll.u32 %s225_s4, 7  ;;  %s236_s24 = scalar_lea.sflag [#allocation7], %s225_s4 }
  0x24   : > { %s1682_s10 = scalar_lea.vmem [#allocation6], %s1112_s9 }
  0x25   : > { %1542 = dma.done.wait (%p1642_p7), %s236_s24, 2048  }
  0x26   : > { %1544 = vsyncadd (%p1642_p7), %s236_s24, 4294965248  ;;  %v1323_v0 = vld [vmem:[%s1682_s10 + $0x38] sm:$0xff]  ;;  %v1322_v2 = vld [vmem:[%s1682_s10 + $0x30] sm:$0xff]  ;;  %p1281_p13 = scmp.ne.s32.totalorder %s1563_s15, 0 }
  0x27   : > { %v1331_v1 = vld [vmem:[%s1682_s10 + $0x78] sm:$0xff]  ;;  %557 = vmatpush.bf16.msra.mxu0 %v1323_v0  ;;  %1332 = vmatpush.bf16.msra.mxu2 %v1323_v0  ;;  %v1330_v3 = vld [vmem:[%s1682_s10 + $0x70] sm:$0xff]  ;;  %v1321_v4 = vld [vmem:[%s1682_s10 + $0x28] sm:$0xff] }
  0x28   : > { %631 = vmatpush.bf16.msra.mxu1 %v1331_v1  ;;  %1340 = vmatpush.bf16.msra.mxu3 %v1331_v1  ;;  %v1329_v5 = vld [vmem:[%s1682_s10 + $0x68] sm:$0xff]  ;;  %v1320_v6 = vld [vmem:[%s1682_s10 + $0x20] sm:$0xff]  ;;  %v1319_v8 = vld [vmem:[%s1682_s10 + $0x18] sm:$0xff] }
  0x29   : > { %v1328_v7 = vld [vmem:[%s1682_s10 + $0x60] sm:$0xff]  ;;  %v1327_v9 = vld [vmem:[%s1682_s10 + $0x58] sm:$0xff]  ;;  %v1318_v10 = vld [vmem:[%s1682_s10 + $0x10] sm:$0xff] }
  0x2a   : > { %v1326_v11 = vld [vmem:[%s1682_s10 + $0x50] sm:$0xff]  ;;  %v1317_v12 = vld [vmem:[%s1682_s10 + $0x8] sm:$0xff]  ;;  %v1316_v14 = vld [vmem:[%s1682_s10] sm:$0xff] }
  0x2b   : > { %558 = vmatpush.bf16.msra.mxu0 %v1322_v2  ;;  %1333 = vmatpush.bf16.msra.mxu2 %v1322_v2  ;;  %v1325_v13 = vld [vmem:[%s1682_s10 + $0x48] sm:$0xff]  ;;  %v1324_v15 = vld [vmem:[%s1682_s10 + $0x40] sm:$0xff] }
  0x2c   : > { %632 = vmatpush.bf16.msra.mxu1 %v1330_v3  ;;  %1341 = vmatpush.bf16.msra.mxu3 %v1330_v3  ;;  %v1115_v16 = vld [vmem:[%s1676_s8] sm:$0xf]  ;;  %v1291_v17 = vld [vmem:[%s1676_s8 + $0x4] sm:$0xf0]  ;;  %v1290_v20 = vld [vmem:[%s1676_s8 + $0x4] sm:$0xf] }
  0x2d   : > { %v1163_v18 = vld [vmem:[%s1676_s8 + $0x60] sm:$0xf]  ;;  %v1303_v19 = vld [vmem:[%s1676_s8 + $0x64] sm:$0xf0]  ;;  %v1117_v21 = vld [vmem:[%s1676_s8 + $0x8] sm:$0xf0]  ;;  %v1116_v24 = vor.u32 %v1291_v17, %v1115_v16 }
  0x2e   : > { %v1304_v22 = vld [vmem:[%s1676_s8 + $0x74] sm:$0xf]  ;;  %v1173_v23 = vld [vmem:[%s1676_s8 + $0x78] sm:$0xf0]  ;;  %v1164_v25 = vor.u32 %v1303_v19, %v1163_v18  ;;  %v1120_v26 = vor.u32 %v1290_v20, %v1117_v21  ;;  %v1123_v28 = vld [vmem:[%s1676_s8 + $0x10] sm:$0xf] }
  0x2f   : > { %559 = vmatpush.bf16.msra.mxu0 %v1321_v4  ;;  %1334 = vmatpush.bf16.msra.mxu2 %v1321_v4  ;;  %v1176_v27 = vor.u32 %v1304_v22, %v1173_v23  ;;  %v1293_v29 = vld [vmem:[%s1676_s8 + $0x14] sm:$0xf0]  ;;  %v1171_v30 = vld [vmem:[%s1676_s8 + $0x70] sm:$0xf]  ;;  %v1292_v32 = vld [vmem:[%s1676_s8 + $0x14] sm:$0xf] }
  0x30   : > { %633 = vmatpush.bf16.msra.mxu1 %v1329_v5  ;;  %1342 = vmatpush.bf16.msra.mxu3 %v1329_v5  ;;  %v1305_v31 = vld [vmem:[%s1676_s8 + $0x74] sm:$0xf0]  ;;  %v1125_v33 = vld [vmem:[%s1676_s8 + $0x18] sm:$0xf0]  ;;  %v1306_v34 = vld [vmem:[%s1676_s8 + $0x84] sm:$0xf]  ;;  %v1124_v36 = vor.u32 %v1293_v29, %v1123_v28 }
  0x31   : > { %v1181_v35 = vld [vmem:[%s1676_s8 + $0x88] sm:$0xf0]  ;;  %v1172_v37 = vor.u32 %v1305_v31, %v1171_v30  ;;  %v1128_v38 = vor.u32 %v1292_v32, %v1125_v33  ;;  %v1131_v40 = vld [vmem:[%s1676_s8 + $0x20] sm:$0xf]  ;;  %v1295_v41 = vld [vmem:[%s1676_s8 + $0x24] sm:$0xf0] }
  0x32   : > { %v1184_v39 = vor.u32 %v1306_v34, %v1181_v35  ;;  %v1179_v42 = vld [vmem:[%s1676_s8 + $0x80] sm:$0xf]  ;;  %v1307_v43 = vld [vmem:[%s1676_s8 + $0x84] sm:$0xf0]  ;;  %v1294_v44 = vld [vmem:[%s1676_s8 + $0x24] sm:$0xf]  ;;  %v1132_v48 = vor.u32 %v1295_v41, %v1131_v40 }
  0x33   : > { %560 = vmatpush.bf16.msra.mxu0 %v1320_v6  ;;  %1335 = vmatpush.bf16.msra.mxu2 %v1320_v6  ;;  %v1133_v45 = vld [vmem:[%s1676_s8 + $0x28] sm:$0xf0]  ;;  %v1308_v46 = vld [vmem:[%s1676_s8 + $0x94] sm:$0xf]  ;;  %v1189_v47 = vld [vmem:[%s1676_s8 + $0x98] sm:$0xf0]  ;;  %v1180_v49 = vor.u32 %v1307_v43, %v1179_v42 }
  0x34   : > { %634 = vmatpush.bf16.msra.mxu1 %v1328_v7  ;;  %1343 = vmatpush.bf16.msra.mxu3 %v1328_v7  ;;  %v1136_v50 = vor.u32 %v1294_v44, %v1133_v45  ;;  %v1192_v51 = vor.u32 %v1308_v46, %v1189_v47  ;;  %v1139_v52 = vld [vmem:[%s1676_s8 + $0x30] sm:$0xf]  ;;  %v1297_v53 = vld [vmem:[%s1676_s8 + $0x34] sm:$0xf0]  ;;  %v1296_v56 = vld [vmem:[%s1676_s8 + $0x34] sm:$0xf] }
  0x35   : > { %v1187_v54 = vld [vmem:[%s1676_s8 + $0x90] sm:$0xf]  ;;  %v1309_v55 = vld [vmem:[%s1676_s8 + $0x94] sm:$0xf0]  ;;  %v1141_v57 = vld [vmem:[%s1676_s8 + $0x38] sm:$0xf0]  ;;  %v1140_v60 = vor.u32 %v1297_v53, %v1139_v52 }
  0x36   : > { %v1310_v58 = vld [vmem:[%s1676_s8 + $0xa4] sm:$0xf]  ;;  %v1197_v59 = vld [vmem:[%s1676_s8 + $0xa8] sm:$0xf0]  ;;  %v1188_v61 = vor.u32 %v1309_v55, %v1187_v54  ;;  %v1144_v62 = vor.u32 %v1296_v56, %v1141_v57  ;;  %v1147_v0 = vld [vmem:[%s1676_s8 + $0x40] sm:$0xf] }
  0x37   : > { %561 = vmatpush.bf16.msra.mxu0 %v1319_v8  ;;  %1336 = vmatpush.bf16.msra.mxu2 %v1319_v8  ;;  %v1200_v63 = vor.u32 %v1310_v58, %v1197_v59  ;;  %v1299_v1 = vld [vmem:[%s1676_s8 + $0x44] sm:$0xf0]  ;;  %v1195_v2 = vld [vmem:[%s1676_s8 + $0xa0] sm:$0xf]  ;;  %v1298_v4 = vld [vmem:[%s1676_s8 + $0x44] sm:$0xf] }
  0x38   : > { %635 = vmatpush.bf16.msra.mxu1 %v1327_v9  ;;  %1344 = vmatpush.bf16.msra.mxu3 %v1327_v9  ;;  %v1311_v3 = vld [vmem:[%s1676_s8 + $0xa4] sm:$0xf0]  ;;  %v1149_v5 = vld [vmem:[%s1676_s8 + $0x48] sm:$0xf0]  ;;  %v1312_v6 = vld [vmem:[%s1676_s8 + $0xb4] sm:$0xf]  ;;  %v1148_v8 = vor.u32 %v1299_v1, %v1147_v0 }
  0x39   : > { %v1205_v7 = vld [vmem:[%s1676_s8 + $0xb8] sm:$0xf0]  ;;  %v1196_v9 = vor.u32 %v1311_v3, %v1195_v2  ;;  %v1300_v16 = vld [vmem:[%s1676_s8 + $0x54] sm:$0xf]  ;;  %v1314_v18 = vld [vmem:[%s1676_s8 + $0xc4] sm:$0xf] }
  0x3a   : > { %v1157_v17 = vld [vmem:[%s1676_s8 + $0x58] sm:$0xf0]  ;;  %v1213_v19 = vld [vmem:[%s1676_s8 + $0xc8] sm:$0xf0] }
  0x3b   : > { %562 = vmatpush.bf16.msra.mxu0 %v1318_v10  ;;  %1337 = vmatpush.bf16.msra.mxu2 %v1318_v10  ;;  %v1152_v10 = vor.u32 %v1298_v4, %v1149_v5  ;;  %v1160_v22 = vor.u32 %v1300_v16, %v1157_v17  ;;  %v1216_v23 = vor.u32 %v1314_v18, %v1213_v19 }
  0x3c   : > { %636 = vmatpush.bf16.msra.mxu1 %v1326_v11  ;;  %1345 = vmatpush.bf16.msra.mxu3 %v1326_v11  ;;  %v1208_v11 = vor.u32 %v1312_v6, %v1205_v7 }
  0x3f   : > { %563 = vmatpush.bf16.msra.mxu0 %v1317_v12  ;;  %1338 = vmatpush.bf16.msra.mxu2 %v1317_v12  ;;  %v1155_v12 = vld [vmem:[%s1676_s8 + $0x50] sm:$0xf] }
  0x40   : > { %637 = vmatpush.bf16.msra.mxu1 %v1325_v13  ;;  %1346 = vmatpush.bf16.msra.mxu3 %v1325_v13  ;;  %v1301_v13 = vld [vmem:[%s1676_s8 + $0x54] sm:$0xf0] }
  0x41   : > { %v1156_v20 = vor.u32 %v1301_v13, %v1155_v12 }
  0x43   : > { %564 = vmatpush.bf16.msra.mxu0 %v1316_v14  ;;  %1339 = vmatpush.bf16.msra.mxu2 %v1316_v14  ;;  %v1203_v14 = vld [vmem:[%s1676_s8 + $0xb0] sm:$0xf] }
  0x44   : > { %638 = vmatpush.bf16.msra.mxu1 %v1324_v15  ;;  %1347 = vmatpush.bf16.msra.mxu3 %v1324_v15  ;;  %v1313_v15 = vld [vmem:[%s1676_s8 + $0xb4] sm:$0xf0] }
  0x45   : > { %v1204_v21 = vor.u32 %v1313_v15, %v1203_v14 }
  0x46   : > { %565 = vmatmul.bf16.vlgmr.msra.gmra.mxu0 %v1116_v24  ;;  %595 = vmatmul.bf16.vlgmr.msra.gmra.mxu2 %v1164_v25  ;;  %v1211_v24 = vld [vmem:[%s1676_s8 + $0xc0] sm:$0xf]  ;;  %v1315_v25 = vld [vmem:[%s1676_s8 + $0xc4] sm:$0xf0] }
  0x47   : > { %639 = vmatmul.bf16.vlgmr.msra.gmra.mxu1 %v1120_v26  ;;  %674 = vmatmul.bf16.vlgmr.msra.gmra.mxu3 %v1176_v27  ;;  %v1302_v26 = vld [vmem:[%s1676_s8 + $0x64] sm:$0xf]  ;;  %v1165_v27 = vld [vmem:[%s1676_s8 + $0x68] sm:$0xf0]  ;;  %v1212_v28 = vor.u32 %v1315_v25, %v1211_v24 }
  0x48   : > { %v1168_v29 = vor.u32 %v1302_v26, %v1165_v27 }
  0x56   : > { %570 = vmatmul.bf16.gmra.mxu0 %v1124_v36  ;;  %600 = vmatmul.bf16.gmra.mxu2 %v1172_v37 }
  0x57   : > { %644 = vmatmul.bf16.gmra.mxu1 %v1128_v38  ;;  %679 = vmatmul.bf16.gmra.mxu3 %v1184_v39 }
  0x66   : > { %575 = vmatmul.bf16.gmra.mxu0 %v1132_v48  ;;  %605 = vmatmul.bf16.gmra.mxu2 %v1180_v49 }
  0x67   : > { %649 = vmatmul.bf16.gmra.mxu1 %v1136_v50  ;;  %684 = vmatmul.bf16.gmra.mxu3 %v1192_v51 }
  0x76   : > { %580 = vmatmul.bf16.gmra.mxu0 %v1140_v60  ;;  %610 = vmatmul.bf16.gmra.mxu2 %v1188_v61 }
  0x77   : > { %654 = vmatmul.bf16.gmra.mxu1 %v1144_v62  ;;  %689 = vmatmul.bf16.gmra.mxu3 %v1200_v63 }
  0x86   : > { %585 = vmatmul.bf16.gmra.mxu0 %v1148_v8  ;;  %615 = vmatmul.bf16.gmra.mxu2 %v1196_v9 }
  0x87   : > { %659 = vmatmul.bf16.gmra.mxu1 %v1152_v10  ;;  %694 = vmatmul.bf16.gmra.mxu3 %v1208_v11 }
  0x96   : > { %590 = vmatmul.bf16.gmra.mxu0 %v1156_v20  ;;  %620 = vmatmul.bf16.gmra.mxu2 %v1204_v21 }
  0x97   : > { %664 = vmatmul.bf16.gmra.mxu1 %v1160_v22  ;;  %699 = vmatmul.bf16.gmra.mxu3 %v1216_v23 }
  0xa6   : > { %625 = vmatmul.bf16.gmra.mxu2 %v1212_v28 }
  0xa7   : > { %669 = vmatmul.bf16.gmra.mxu1 %v1168_v29 }
  0xc3   : > { %v566_v30 = vpop.f32.mrf.mxu0 }
  0xc4   : > { %v640_v31 = vpop.f32.mrf.mxu1 }
  0xc5   : > { %v1756_v32 = vadd.f32 %v640_v31, %v566_v30 }
  0xc9   : > { %v1758_v33 = vpop.f32.mrf.mxu2 }
  0xca   : > { %v675_v34 = vpop.f32.mrf.mxu3 }
  0xcb   : > { %v568_v35 = vpop.f32.mrf.mxu0 }
  0xcc   : > { %v642_v36 = vpop.f32.mrf.mxu1 }
  0xcd   : > { %v1760_v37 = vadd.f32 %v642_v36, %v568_v35 }
  0xd1   : > { %v1762_v38 = vpop.f32.mrf.mxu2 }
  0xd2   : > { %v677_v39 = vpop.f32.mrf.mxu3 }
  0xd3   : > { %v571_v40 = vpop.f32.mrf.mxu0 }
  0xd4   : > { %v645_v41 = vpop.f32.mrf.mxu1 }
  0xd5   : > { %v1764_v42 = vadd.f32 %v645_v41, %v571_v40 }
  0xd9   : > { %v601_v43 = vpop.f32.mrf.mxu2 }
  0xda   : > { %v1766_v44 = vadd.f32 %v675_v34, %v601_v43  ;;  %v680_v45 = vpop.f32.mrf.mxu3 }
  0xdb   : > { %v573_v46 = vpop.f32.mrf.mxu0 }
  0xdc   : > { %v647_v47 = vpop.f32.mrf.mxu1 }
  0xdd   : > { %v1768_v48 = vadd.f32 %v647_v47, %v573_v46 }
  0xe1   : > { %v603_v49 = vpop.f32.mrf.mxu2 }
  0xe2   : > { %v1770_v50 = vadd.f32 %v677_v39, %v603_v49  ;;  %v682_v51 = vpop.f32.mrf.mxu3 }
  0xe3   : > { %v576_v52 = vpop.f32.mrf.mxu0 }
  0xe4   : > { %v650_v53 = vpop.f32.mrf.mxu1 }
  0xe5   : > { %v1772_v54 = vadd.f32 %v650_v53, %v576_v52 }
  0xe9   : > { %v606_v55 = vpop.f32.mrf.mxu2 }
  0xea   : > { %v1774_v56 = vadd.f32 %v680_v45, %v606_v55  ;;  %v685_v58 = vpop.f32.mrf.mxu3 }
  0xeb   : > { %v578_v57 = vpop.f32.mrf.mxu0 }
  0xec   : > { %v652_v59 = vpop.f32.mrf.mxu1 }
  0xed   : > { %v1776_v60 = vadd.f32 %v652_v59, %v578_v57 }
  0xf1   : > { %v608_v61 = vpop.f32.mrf.mxu2 }
  0xf2   : > { %v1778_v62 = vadd.f32 %v682_v51, %v608_v61  ;;  %v687_v2 = vpop.f32.mrf.mxu3 }
  0xf3   : > { %v581_v63 = vpop.f32.mrf.mxu0 }
  0xf4   : > { %v655_v0 = vpop.f32.mrf.mxu1 }
  0xf5   : > { %v1780_v1 = vadd.f32 %v655_v0, %v581_v63 }
  0xf9   : > { %v611_v3 = vpop.f32.mrf.mxu2 }
  0xfa   : > { %v1782_v4 = vadd.f32 %v685_v58, %v611_v3  ;;  %v690_v8 = vpop.f32.mrf.mxu3 }
  0xfb   : > { %v583_v5 = vpop.f32.mrf.mxu0 }
  0xfc   : > { %v657_v6 = vpop.f32.mrf.mxu1 }
  0xfd   : > { %v1784_v7 = vadd.f32 %v657_v6, %v583_v5 }
 0x101   : > { %v613_v9 = vpop.f32.mrf.mxu2 }
 0x102   : > { %v1786_v10 = vadd.f32 %v687_v2, %v613_v9  ;;  %v692_v15 = vpop.f32.mrf.mxu3 }
 0x103   : > { %v586_v11 = vpop.f32.mrf.mxu0 }
 0x104   : > { %v660_v12 = vpop.f32.mrf.mxu1 }
 0x105   : > { %v1788_v13 = vadd.f32 %v660_v12, %v586_v11 }
 0x109   : > { %v616_v14 = vpop.f32.mrf.mxu2 }
 0x10a   : > { %v1790_v16 = vadd.f32 %v690_v8, %v616_v14  ;;  %v695_v22 = vpop.f32.mrf.mxu3 }
 0x10b   : > { %v588_v17 = vpop.f32.mrf.mxu0 }
 0x10c   : > { %v662_v18 = vpop.f32.mrf.mxu1 }
 0x10d   : > { %v1792_v19 = vadd.f32 %v662_v18, %v588_v17 }
 0x111   : > { %v618_v20 = vpop.f32.mrf.mxu2 }
 0x112   : > { %v1794_v21 = vadd.f32 %v692_v15, %v618_v20  ;;  %v697_v30 = vpop.f32.mrf.mxu3 }
 0x113   : > { %v591_v23 = vpop.f32.mrf.mxu0 }
 0x114   : > { %v665_v24 = vpop.f32.mrf.mxu1 }
 0x115   : > { %v1796_v25 = vadd.f32 %v665_v24, %v591_v23 }
 0x119   : > { %v621_v26 = vpop.f32.mrf.mxu2 }
 0x11a   : > { %v1798_v27 = vadd.f32 %v695_v22, %v621_v26  ;;  %v700_v40 = vpop.f32.mrf.mxu3 }
 0x11b   : > { %v593_v28 = vpop.f32.mrf.mxu0 }
 0x11c   : > { %v667_v29 = vpop.f32.mrf.mxu1 }
 0x11d   : > { %v1800_v31 = vadd.f32 %v667_v29, %v593_v28 }
 0x121   : > { %v623_v34 = vpop.f32.mrf.mxu2 }
 0x122   : > { %v1802_v35 = vadd.f32 %v697_v30, %v623_v34  ;;  %v702_v47 = vpop.f32.mrf.mxu3 }
 0x124   : > { %v670_v36 = vpop.f32.mrf.mxu1 }
 0x125   : > { %v1805_v39 = vadd.f32 %v670_v36, %v1758_v33 }
 0x129   : > { %v626_v41 = vpop.f32.mrf.mxu2 }
 0x12a   : > { %v1807_v43 = vadd.f32 %v700_v40, %v626_v41 }
 0x12c   : > { %v672_v45 = vpop.f32.mrf.mxu1 }
 0x12d   : > { %v1810_v46 = vadd.f32 %v672_v45, %v1762_v38 }
 0x12e   : > { %708 = sbr.rel (%p1281_p13) target bundleno = 333 (0x14d), region = 44 }
 0x131   : > { %v628_v49 = vpop.f32.mrf.mxu2 }
 0x132   : > { %v1812_v51 = vadd.f32 %v702_v47, %v628_v49 }
 0x133   : > { %709 = vst [vmem:[#allocation2 + $0xb0] sm:$0xff] %v1756_v32 }
 0x134   : > { %710 = vst [vmem:[#allocation2] sm:$0xff] %v1760_v37 }
 0x135   : > { %711 = vst [vmem:[#allocation2 + $0x10] sm:$0xff] %v1764_v42 }
 0x136   : > { %712 = vst [vmem:[#allocation2 + $0x48] sm:$0xff] %v1768_v48 }
 0x137   : > { %713 = vst [vmem:[#allocation2 + $0x60] sm:$0xff] %v1772_v54 }
 0x138   : > { %714 = vst [vmem:[#allocation2 + $0x28] sm:$0xff] %v1776_v60 }
 0x139   : > { %715 = vst [vmem:[#allocation2 + $0x40] sm:$0xff] %v1780_v1 }
 0x13a   : > { %716 = vst [vmem:[#allocation2 + $0x78] sm:$0xff] %v1784_v7 }
 0x13b   : > { %717 = vst [vmem:[#allocation2 + $0x80] sm:$0xff] %v1788_v13 }
 0x13c   : > { %718 = vst [vmem:[#allocation2 + $0xa8] sm:$0xff] %v1792_v19 }
 0x13d   : > { %719 = vst [vmem:[#allocation2 + $0x50] sm:$0xff] %v1796_v25 }
 0x13e   : > { %720 = vst [vmem:[#allocation2 + $0x30] sm:$0xff] %v1800_v31 }
 0x13f   : > { %721 = vst [vmem:[#allocation2 + $0x88] sm:$0xff] %v1805_v39 }
 0x140   : > { %722 = vst [vmem:[#allocation2 + $0x70] sm:$0xff] %v1810_v46 }
 0x141   : > { %723 = vst [vmem:[#allocation2 + $0x8] sm:$0xff] %v1766_v44 }
 0x142   : > { %724 = vst [vmem:[#allocation2 + $0x38] sm:$0xff] %v1770_v50 }
 0x143   : > { %725 = vst [vmem:[#allocation2 + $0x20] sm:$0xff] %v1774_v56 }
 0x144   : > { %726 = vst [vmem:[#allocation2 + $0xb8] sm:$0xff] %v1778_v62 }
 0x145   : > { %727 = vst [vmem:[#allocation2 + $0x58] sm:$0xff] %v1782_v4 }
 0x146   : > { %728 = vst [vmem:[#allocation2 + $0xc8] sm:$0xff] %v1786_v10 }
 0x147   : > { %729 = vst [vmem:[#allocation2 + $0xa0] sm:$0xff] %v1790_v16 }
 0x148   : > { %730 = vst [vmem:[#allocation2 + $0x90] sm:$0xff] %v1794_v21 }
 0x149   : > { %731 = vst [vmem:[#allocation2 + $0x98] sm:$0xff] %v1798_v27 }
 0x14a   : > { %732 = vst [vmem:[#allocation2 + $0x18] sm:$0xff] %v1802_v35 }
 0x14b   : > { %733 = vst [vmem:[#allocation2 + $0xc0] sm:$0xff] %v1807_v43 }
 0x14c   : > { %734 = vst [vmem:[#allocation2 + $0x68] sm:$0xff] %v1812_v51 }
 0x14d PF: > { %p1282_p0 = scmp.le.s32.totalorder %s1563_s15, 0 }
 0x14f   : > { %738 = sbr.rel (%p1282_p0) target bundleno = 369 (0x171), region = 48 }
 0x154   : > { %v739_v33 = vld [vmem:[#allocation2 + $0xb0] sm:$0xff]  ;;  %v740_v38 = vld [vmem:[#allocation2] sm:$0xff]  ;;  %v742_v58 = vld [vmem:[#allocation2 + $0x48] sm:$0xff] }
 0x155   : > { %v741_v52 = vld [vmem:[#allocation2 + $0x10] sm:$0xff]  ;;  %v765_v53 = vadd.f32 %v739_v33, %v1756_v32  ;;  %v766_v55 = vadd.f32 %v740_v38, %v1760_v37  ;;  %v743_v59 = vld [vmem:[#allocation2 + $0x60] sm:$0xff]  ;;  %v744_v61 = vld [vmem:[#allocation2 + $0x28] sm:$0xff]  ;;  %v768_v63 = vadd.f32 %v742_v58, %v1768_v48 }
 0x156   : > { %v767_v57 = vadd.f32 %v741_v52, %v1764_v42  ;;  %v745_v0 = vld [vmem:[#allocation2 + $0x40] sm:$0xff]  ;;  %v769_v2 = vadd.f32 %v743_v59, %v1772_v54  ;;  %v746_v3 = vld [vmem:[#allocation2 + $0x78] sm:$0xff]  ;;  %v770_v5 = vadd.f32 %v744_v61, %v1776_v60  ;;  %v748_v37 = vld [vmem:[#allocation2 + $0xa8] sm:$0xff] }
 0x157   : > { %791 = vst [vmem:[#allocation2 + $0xb0] sm:$0xff] %v765_v53  ;;  %v747_v6 = vld [vmem:[#allocation2 + $0x80] sm:$0xff]  ;;  %v771_v32 = vadd.f32 %v745_v0, %v1780_v1  ;;  %v772_v42 = vadd.f32 %v746_v3, %v1784_v7  ;;  %v749_v8 = vld [vmem:[#allocation2 + $0x50] sm:$0xff]  ;;  %v774_v54 = vadd.f32 %v748_v37, %v1792_v19  ;;  %v751_v11 = vld [vmem:[#allocation2 + $0x88] sm:$0xff] }
 0x158   : > { %792 = vst [vmem:[#allocation2] sm:$0xff] %v766_v55  ;;  %v773_v48 = vadd.f32 %v747_v6, %v1788_v13  ;;  %v750_v9 = vld [vmem:[#allocation2 + $0x30] sm:$0xff]  ;;  %v775_v60 = vadd.f32 %v749_v8, %v1796_v25  ;;  %v753_v14 = vld [vmem:[#allocation2 + $0x8] sm:$0xff]  ;;  %v777_v7 = vadd.f32 %v751_v11, %v1805_v39  ;;  %v754_v15 = vld [vmem:[#allocation2 + $0x38] sm:$0xff] }
 0x159   : > { %793 = vst [vmem:[#allocation2 + $0x10] sm:$0xff] %v767_v57  ;;  %v752_v12 = vld [vmem:[#allocation2 + $0x70] sm:$0xff]  ;;  %v776_v1 = vadd.f32 %v750_v9, %v1800_v31  ;;  %v755_v17 = vld [vmem:[#allocation2 + $0x20] sm:$0xff]  ;;  %v779_v18 = vadd.f32 %v753_v14, %v1766_v44  ;;  %v756_v19 = vld [vmem:[#allocation2 + $0xb8] sm:$0xff]  ;;  %v780_v20 = vadd.f32 %v754_v15, %v1770_v50 }
 0x15a   : > { %794 = vst [vmem:[#allocation2 + $0x48] sm:$0xff] %v768_v63  ;;  %v778_v13 = vadd.f32 %v752_v12, %v1810_v46  ;;  %v757_v22 = vld [vmem:[#allocation2 + $0x58] sm:$0xff]  ;;  %v781_v23 = vadd.f32 %v755_v17, %v1774_v56  ;;  %v758_v24 = vld [vmem:[#allocation2 + $0xc8] sm:$0xff]  ;;  %v782_v25 = vadd.f32 %v756_v19, %v1778_v62  ;;  %v759_v26 = vld [vmem:[#allocation2 + $0xa0] sm:$0xff] }
 0x15b   : > { %795 = vst [vmem:[#allocation2 + $0x60] sm:$0xff] %v769_v2  ;;  %v783_v28 = vadd.f32 %v757_v22, %v1782_v4  ;;  %v760_v29 = vld [vmem:[#allocation2 + $0x90] sm:$0xff]  ;;  %v784_v44 = vadd.f32 %v758_v24, %v1786_v10  ;;  %v761_v30 = vld [vmem:[#allocation2 + $0x98] sm:$0xff]  ;;  %v785_v50 = vadd.f32 %v759_v26, %v1790_v16  ;;  %v763_v34 = vld [vmem:[#allocation2 + $0xc0] sm:$0xff] }
 0x15c   : > { %796 = vst [vmem:[#allocation2 + $0x28] sm:$0xff] %v770_v5  ;;  %v762_v31 = vld [vmem:[#allocation2 + $0x18] sm:$0xff]  ;;  %v786_v56 = vadd.f32 %v760_v29, %v1794_v21  ;;  %v787_v62 = vadd.f32 %v761_v30, %v1798_v27  ;;  %v764_v36 = vld [vmem:[#allocation2 + $0x68] sm:$0xff]  ;;  %v789_v39 = vadd.f32 %v763_v34, %v1807_v43 }
 0x15d   : > { %797 = vst [vmem:[#allocation2 + $0x40] sm:$0xff] %v771_v32  ;;  %v788_v4 = vadd.f32 %v762_v31, %v1802_v35  ;;  %v790_v10 = vadd.f32 %v764_v36, %v1812_v51 }
 0x15e   : > { %798 = vst [vmem:[#allocation2 + $0x78] sm:$0xff] %v772_v42 }
 0x15f   : > { %799 = vst [vmem:[#allocation2 + $0x80] sm:$0xff] %v773_v48 }
 0x160   : > { %800 = vst [vmem:[#allocation2 + $0xa8] sm:$0xff] %v774_v54 }
 0x161   : > { %801 = vst [vmem:[#allocation2 + $0x50] sm:$0xff] %v775_v60 }
 0x162   : > { %802 = vst [vmem:[#allocation2 + $0x30] sm:$0xff] %v776_v1 }
 0x163   : > { %803 = vst [vmem:[#allocation2 + $0x88] sm:$0xff] %v777_v7 }
 0x164   : > { %804 = vst [vmem:[#allocation2 + $0x70] sm:$0xff] %v778_v13 }
 0x165   : > { %805 = vst [vmem:[#allocation2 + $0x8] sm:$0xff] %v779_v18 }
 0x166   : > { %806 = vst [vmem:[#allocation2 + $0x38] sm:$0xff] %v780_v20 }
 0x167   : > { %807 = vst [vmem:[#allocation2 + $0x20] sm:$0xff] %v781_v23 }
 0x168   : > { %808 = vst [vmem:[#allocation2 + $0xb8] sm:$0xff] %v782_v25 }
 0x169   : > { %809 = vst [vmem:[#allocation2 + $0x58] sm:$0xff] %v783_v28 }
 0x16a   : > { %810 = vst [vmem:[#allocation2 + $0xc8] sm:$0xff] %v784_v44 }
 0x16b   : > { %811 = vst [vmem:[#allocation2 + $0xa0] sm:$0xff] %v785_v50 }
 0x16c   : > { %812 = vst [vmem:[#allocation2 + $0x90] sm:$0xff] %v786_v56 }
 0x16d   : > { %813 = vst [vmem:[#allocation2 + $0x98] sm:$0xff] %v787_v62 }
 0x16e   : > { %814 = vst [vmem:[#allocation2 + $0x18] sm:$0xff] %v788_v4 }
 0x16f   : > { %815 = vst [vmem:[#allocation2 + $0xc0] sm:$0xff] %v789_v39 }
 0x170   : > { %816 = vst [vmem:[#allocation2 + $0x68] sm:$0xff] %v790_v10 }
 0x171 PF: > { %p1283_p1 = scmp.ne.s32.totalorder %s1563_s15, 2 }
 0x173   : > { %820 = sbr.rel (%p1283_p1) target bundleno = 408 (0x198), region = 52 }
 0x178   : > { %v821_v16 = vld [vmem:[#allocation2 + $0xb0] sm:$0xff]  ;;  %v1872_v21 = vld [vmem:[%s1925_s2] ss:$0 sm:$0xff]  ;;  %v824_v40 = vld [vmem:[#allocation2 + $0x48] sm:$0xff] }
 0x179   : > { %v822_v27 = vld [vmem:[#allocation2] sm:$0xff]  ;;  %v823_v35 = vld [vmem:[#allocation2 + $0x10] sm:$0xff]  ;;  %v851_v41 = vadd.f32 %v1872_v21, %v821_v16  ;;  %v854_v46 = vadd.f32 %v1872_v21, %v824_v40  ;;  %v826_v49 = vld [vmem:[#allocation2 + $0x28] sm:$0xff] }
 0x17a   : > { %v852_v43 = vadd.f32 %v1872_v21, %v822_v27  ;;  %v853_v45 = vadd.f32 %v1872_v21, %v823_v35  ;;  %v825_v47 = vld [vmem:[#allocation2 + $0x60] sm:$0xff]  ;;  %v856_v38 = vadd.f32 %v1872_v21, %v826_v49  ;;  %v828_v53 = vld [vmem:[#allocation2 + $0x78] sm:$0xff]  ;;  %v830_v3 = vld [vmem:[#allocation2 + $0xa8] sm:$0xff] }
 0x17b   : > { %v827_v51 = vld [vmem:[#allocation2 + $0x40] sm:$0xff]  ;;  %v855_v33 = vadd.f32 %v1872_v21, %v825_v47  ;;  %vm877_vm0 = vcmp.gt.f32.partialorder %v851_v41, 0.0  ;;  %v903_v55 = vmul.f32 0.1, %v851_v41  ;;  %vm880_vm3 = vcmp.gt.f32.partialorder %v854_v46, 0.0  ;;  %v831_v5 = vld [vmem:[#allocation2 + $0x50] sm:$0xff] }
 0x17c   : > { %v857_v52 = vadd.f32 %v1872_v21, %v827_v51  ;;  %vm878_vm1 = vcmp.gt.f32.partialorder %v852_v43, 0.0  ;;  %v904_v57 = vmul.f32 0.1, %v852_v43  ;;  %vm879_vm2 = vcmp.gt.f32.partialorder %v853_v45, 0.0  ;;  %v829_v2 = vld [vmem:[#allocation2 + $0x80] sm:$0xff]  ;;  %v832_v42 = vld [vmem:[#allocation2 + $0x30] sm:$0xff] }
 0x17d   : > { %v905_v58 = vmul.f32 0.1, %v853_v45  ;;  %v906_v59 = vmul.f32 0.1, %v854_v46  ;;  %v929_v61 = vsel %vm877_vm0, %v851_v41, %v903_v55  ;;  %vm881_vm4 = vcmp.gt.f32.partialorder %v855_v33, 0.0  ;;  %v833_v1 = vld [vmem:[#allocation2 + $0x88] sm:$0xff] }
 0x17e   : > { %v930_v63 = vsel %vm878_vm1, %v852_v43, %v904_v57  ;;  %v907_v0 = vmul.f32 0.1, %v855_v33  ;;  %955 = vst [vmem:[#allocation8] sm:$0xff] %v929_v61  ;;  %vm882_vm5 = vcmp.gt.f32.partialorder %v856_v38, 0.0  ;;  %v908_v37 = vmul.f32 0.1, %v856_v38 }
 0x17f   : > { %v931_v6 = vsel %vm879_vm2, %v853_v45, %v905_v58  ;;  %v932_v32 = vsel %vm880_vm3, %v854_v46, %v906_v59  ;;  %956 = vst [vmem:[#allocation8 + $0x8] sm:$0xff] %v930_v63  ;;  %vm883_vm6 = vcmp.gt.f32.partialorder %v857_v52, 0.0  ;;  %v909_v48 = vmul.f32 0.1, %v857_v52  ;;  %v834_v14 = vld [vmem:[#allocation2 + $0x70] sm:$0xff]  ;;  %v835_v17 = vld [vmem:[#allocation2 + $0x8] sm:$0xff] }
 0x180   : > { %v933_v8 = vsel %vm881_vm4, %v855_v33, %v907_v0  ;;  %v858_v9 = vadd.f32 %v1872_v21, %v828_v53  ;;  %957 = vst [vmem:[#allocation8 + $0x10] sm:$0xff] %v931_v6  ;;  %v934_v54 = vsel %vm882_vm5, %v856_v38, %v908_v37  ;;  %v859_v11 = vadd.f32 %v1872_v21, %v829_v2  ;;  %v836_v18 = vld [vmem:[#allocation2 + $0x38] sm:$0xff]  ;;  %v837_v29 = vld [vmem:[#allocation2 + $0x20] sm:$0xff]  ;;  %v840_v4 = vld [vmem:[#allocation2 + $0xc8] sm:$0xff] }
 0x181   : > { %v860_v60 = vadd.f32 %v1872_v21, %v830_v3  ;;  %v861_v12 = vadd.f32 %v1872_v21, %v831_v5  ;;  %958 = vst [vmem:[#allocation8 + $0x18] sm:$0xff] %v932_v32  ;;  %v935_v7 = vsel %vm883_vm6, %v857_v52, %v909_v48  ;;  %v862_v13 = vadd.f32 %v1872_v21, %v832_v42  ;;  %v838_v56 = vld [vmem:[#allocation2 + $0xb8] sm:$0xff]  ;;  %v841_v41 = vld [vmem:[#allocation2 + $0xa0] sm:$0xff]  ;;  %v842_v43 = vld [vmem:[#allocation2 + $0x90] sm:$0xff] }
 0x182   : > { %vm884_vm7 = vcmp.gt.f32.partialorder %v858_v9, 0.0  ;;  %v910_v15 = vmul.f32 0.1, %v858_v9  ;;  %959 = vst [vmem:[#allocation8 + $0x20] sm:$0xff] %v933_v8  ;;  %vm885_vm8 = vcmp.gt.f32.partialorder %v859_v11, 0.0  ;;  %v863_v26 = vadd.f32 %v1872_v21, %v833_v1  ;;  %v839_v34 = vld [vmem:[#allocation2 + $0x58] sm:$0xff] }
 0x183   : > { %v911_v19 = vmul.f32 0.1, %v859_v11  ;;  %vm886_vm9 = vcmp.gt.f32.partialorder %v860_v60, 0.0  ;;  %vm887_vm10 = vcmp.gt.f32.partialorder %v861_v12, 0.0  ;;  %960 = vst [vmem:[#allocation8 + $0x28] sm:$0xff] %v934_v54  ;;  %vm888_vm11 = vcmp.gt.f32.partialorder %v862_v13, 0.0 }
 0x184   : > { %v936_v20 = vsel %vm884_vm7, %v858_v9, %v910_v15  ;;  %v912_v22 = vmul.f32 0.1, %v860_v60  ;;  %v913_v23 = vmul.f32 0.1, %v861_v12  ;;  %961 = vst [vmem:[#allocation8 + $0x30] sm:$0xff] %v935_v7  ;;  %v864_v28 = vadd.f32 %v1872_v21, %v834_v14  ;;  %v843_v49 = vld [vmem:[#allocation2 + $0x98] sm:$0xff] }
 0x185   : > { %v937_v24 = vsel %vm885_vm8, %v859_v11, %v911_v19  ;;  %v914_v25 = vmul.f32 0.1, %v862_v13  ;;  %962 = vst [vmem:[#allocation8 + $0x38] sm:$0xff] %v936_v20  ;;  %v865_v50 = vadd.f32 %v1872_v21, %v835_v17  ;;  %v866_v31 = vadd.f32 %v1872_v21, %v836_v18  ;;  %v844_v58 = vld [vmem:[#allocation2 + $0x18] sm:$0xff]  ;;  %v845_v0 = vld [vmem:[#allocation2 + $0xc0] sm:$0xff]  ;;  %v846_v2 = vld [vmem:[#allocation2 + $0x68] sm:$0xff] }
 0x186   : > { %v938_v44 = vsel %vm886_vm9, %v860_v60, %v912_v22  ;;  %v939_v30 = vsel %vm887_vm10, %v861_v12, %v913_v23  ;;  %963 = vst [vmem:[#allocation8 + $0x40] sm:$0xff] %v937_v24  ;;  %vm889_vm12 = vcmp.gt.f32.partialorder %v863_v26, 0.0  ;;  %v915_v36 = vmul.f32 0.1, %v863_v26 }
 0x187   : > { %v940_v62 = vsel %vm888_vm11, %v862_v13, %v914_v25  ;;  %vm890_vm13 = vcmp.gt.f32.partialorder %v864_v28, 0.0  ;;  %964 = vst [vmem:[#allocation8 + $0x48] sm:$0xff] %v938_v44  ;;  %v916_v39 = vmul.f32 0.1, %v864_v28  ;;  %vm891_vm14 = vcmp.gt.f32.partialorder %v865_v50, 0.0 }
 0x188   : > { %v917_v10 = vmul.f32 0.1, %v865_v50  ;;  %v867_v16 = vadd.f32 %v1872_v21, %v837_v29  ;;  %965 = vst [vmem:[#allocation8 + $0x50] sm:$0xff] %v939_v30  ;;  %v941_v27 = vsel %vm889_vm12, %v863_v26, %v915_v36  ;;  %vm892_vm15 = vcmp.gt.f32.partialorder %v866_v31, 0.0 }
 0x189   : > { %v918_v35 = vmul.f32 0.1, %v866_v31  ;;  %v868_v40 = vadd.f32 %v1872_v21, %v838_v56  ;;  %966 = vst [vmem:[#allocation8 + $0x58] sm:$0xff] %v940_v62  ;;  %v942_v45 = vsel %vm890_vm13, %v864_v28, %v916_v39  ;;  %v869_v38 = vadd.f32 %v1872_v21, %v839_v34 }
 0x18a   : > { %v943_v46 = vsel %vm891_vm14, %v865_v50, %v917_v10  ;;  %vm893_vm0 = vcmp.gt.f32.partialorder %v867_v16, 0.0  ;;  %v919_v47 = vmul.f32 0.1, %v867_v16  ;;  %967 = vst [vmem:[#allocation8 + $0x60] sm:$0xff] %v941_v27  ;;  %v870_v53 = vadd.f32 %v1872_v21, %v840_v4 }
 0x18b   : > { %v944_v51 = vsel %vm892_vm15, %v866_v31, %v918_v35  ;;  %vm894_vm1 = vcmp.gt.f32.partialorder %v868_v40, 0.0  ;;  %v920_v33 = vmul.f32 0.1, %v868_v40  ;;  %968 = vst [vmem:[#allocation8 + $0x68] sm:$0xff] %v942_v45  ;;  %v871_v55 = vadd.f32 %v1872_v21, %v841_v41 }
 0x18c   : > { %v945_v52 = vsel %vm893_vm0, %v867_v16, %v919_v47  ;;  %v872_v57 = vadd.f32 %v1872_v21, %v842_v43  ;;  %969 = vst [vmem:[#allocation8 + $0x70] sm:$0xff] %v943_v46  ;;  %vm895_vm2 = vcmp.gt.f32.partialorder %v869_v38, 0.0  ;;  %v921_v61 = vmul.f32 0.1, %v869_v38 }
 0x18d   : > { %v946_v59 = vsel %vm894_vm1, %v868_v40, %v920_v33  ;;  %v873_v63 = vadd.f32 %v1872_v21, %v843_v49  ;;  %970 = vst [vmem:[#allocation8 + $0x78] sm:$0xff] %v944_v51  ;;  %vm896_vm3 = vcmp.gt.f32.partialorder %v870_v53, 0.0  ;;  %v922_v3 = vmul.f32 0.1, %v870_v53 }
 0x18e   : > { %vm897_vm4 = vcmp.gt.f32.partialorder %v871_v55, 0.0  ;;  %vm898_vm5 = vcmp.gt.f32.partialorder %v872_v57, 0.0  ;;  %971 = vst [vmem:[#allocation8 + $0x80] sm:$0xff] %v945_v52  ;;  %v947_v5 = vsel %vm895_vm2, %v869_v38, %v921_v61  ;;  %v923_v6 = vmul.f32 0.1, %v871_v55 }
 0x18f   : > { %v924_v32 = vmul.f32 0.1, %v872_v57  ;;  %vm899_vm6 = vcmp.gt.f32.partialorder %v873_v63, 0.0  ;;  %972 = vst [vmem:[#allocation8 + $0x88] sm:$0xff] %v946_v59  ;;  %v948_v37 = vsel %vm896_vm3, %v870_v53, %v922_v3  ;;  %v925_v42 = vmul.f32 0.1, %v873_v63 }
 0x190   : > { %v874_v8 = vadd.f32 %v1872_v21, %v844_v58  ;;  %v875_v48 = vadd.f32 %v1872_v21, %v845_v0  ;;  %973 = vst [vmem:[#allocation8 + $0x90] sm:$0xff] %v947_v5  ;;  %v949_v9 = vsel %vm897_vm4, %v871_v55, %v923_v6  ;;  %v876_v11 = vadd.f32 %v1872_v21, %v846_v2 }
 0x191   : > { %v950_v54 = vsel %vm898_vm5, %v872_v57, %v924_v32  ;;  %974 = vst [vmem:[#allocation8 + $0x98] sm:$0xff] %v948_v37  ;;  %v951_v60 = vsel %vm899_vm6, %v873_v63, %v925_v42 }
 0x192   : > { %vm900_vm7 = vcmp.gt.f32.partialorder %v874_v8, 0.0  ;;  %v926_v12 = vmul.f32 0.1, %v874_v8  ;;  %vm901_vm8 = vcmp.gt.f32.partialorder %v875_v48, 0.0  ;;  %975 = vst [vmem:[#allocation8 + $0xa0] sm:$0xff] %v949_v9  ;;  %vm902_vm9 = vcmp.gt.f32.partialorder %v876_v11, 0.0 }
 0x193   : > { %v927_v1 = vmul.f32 0.1, %v875_v48  ;;  %v928_v14 = vmul.f32 0.1, %v876_v11  ;;  %976 = vst [vmem:[#allocation8 + $0xa8] sm:$0xff] %v950_v54 }
 0x194   : > { %v952_v7 = vsel %vm900_vm7, %v874_v8, %v926_v12  ;;  %977 = vst [vmem:[#allocation8 + $0xb0] sm:$0xff] %v951_v60 }
 0x195   : > { %v953_v15 = vsel %vm901_vm8, %v875_v48, %v927_v1  ;;  %v954_v13 = vsel %vm902_vm9, %v876_v11, %v928_v14  ;;  %978 = vst [vmem:[#allocation8 + $0xb8] sm:$0xff] %v952_v7 }
 0x196   : > { %979 = vst [vmem:[#allocation8 + $0xc0] sm:$0xff] %v953_v15 }
 0x197   : > { %980 = vst [vmem:[#allocation8 + $0xc8] sm:$0xff] %v954_v13 }
 0x198 PF: > { %s1930_s15 = sadd.s32 4294967295, %s1571_s17   ;;  %s992_s12 = sshll.u32 %s1926_s3, 4  ;;  %s993_s12 = int_to_ptr.hbm [resolvable:$true] %s992_s12 }
 0x199   : > { %p1366_p2 = scmp.eq.s32.totalorder %s1930_s15, 2  ;;  %s1578_s20 = smov [#allocation8]  }
 0x19a   : > { %s990_s21 = sshll.u32 %s1578_s20, 4  ;;  %s1579_s25 = smov 128   ;;  %s991_s21 = int_to_ptr.vmem [resolvable:$true] %s990_s21 }
 0x19b   : > { %s1580_s26 = smov 8  }
 0x19c   : > { %1355 = dma.vmem_to_hbm [thread:$0]  (%p1366_p2), %s991_s21, 3328, %s993_s12, [#allocation5], %s1579_s25, %s1579_s25, %s1580_s26  }
 0x19d   : > { %1546 = dma.done.wait (%p1366_p2), [#allocation5], 3328  }
 0x19e   : > { %1548 = vsyncadd (%p1366_p2), [#allocation5], 4294963968 }
 0x19f PF: > { %s20_s17 = sadd.s32 1, %s1571_s17   ;;  %s1931_s12 = smov %s1555_s13 }
 0x1a0   : > { %p17_p3 = scmp.ge.s32.totalorder %s20_s17, 5   ;;  %s1932_s13 = smov %s1559_s14 }
 0x1a1   : > { %s1933_s14 = smov %s1648_s23  ;;  %s1934_s15 = smov %s1567_s16 }
 0x1a2   : > { %s1935_s16 = smov %s1937_s19  ;;  %19 = sbr.rel (!%p17_p3) target bundleno = 7 (0x7), region = 98 }
 0x1a7   :  { %1009 = vsyncpa [#allocation4], 1 }
 0x1a8   :  { %1011 = vsyncpa [#allocation4 + $0x1], 1 }
 0x1a9   :  { %1012 = vsyncpa [#allocation7], 1 }
 0x1aa   :  { %1014 = vsyncpa [#allocation7 + $0x1], 1 }
 0x1ab   :  { %1015 = vsyncpa [#allocation5], 1 }
 0x1ac   :  { %1017 = vsyncpa [#allocation5 + $0x1], 1 }

</bundles_post_ra>
